<compile_context>
chip_gen: v7x
topology: tpu7x:2x2x1
jax: 0.10.0
libtpu: 0.0.40
codegen_flags: <defaults>
</compile_context>

<pallas_src>
import jax
import jax.numpy as jnp
from jax.experimental import pallas as pl
from jax.experimental.pallas import tpu as pltpu


def _word2vec_kernel(h_ref,       # (TILE_B, N)   bf16  VMEM (per batch tile)
                     w_ref,       # (N, TILE_V)   bf16  VMEM (streamed over j)
                     b_ref,       # (1, TILE_V)   f32   VMEM (streamed over j)
                     logits_ref,  # (TILE_B, V)   f32   resident across j
                     probs_ref):  # (TILE_B, V)   f32   resident across j
    j = pl.program_id(1)
    tile_v = w_ref.shape[1]

    # Output projection for this vocab tile: canonical (M,K)x(K,N) MXU dot,
    # bf16 inputs, f32 accumulation.  W_out was pre-transposed to (N, V) in
    # HBM once, so no per-tile layout work is needed here.
    logits_tile = jnp.dot(h_ref[...], w_ref[...],
                          preferred_element_type=jnp.float32) + b_ref[...]

    col = pl.multiple_of(j * tile_v, 128)          # wide, lane-aligned store
    logits_ref[:, pl.ds(col, tile_v)] = logits_tile

    # Finalize: softmax over the full resident (TILE_B, V) logits slab.
    # TODO(synk): for very large V, replace the resident slab + single-shot
    # softmax with an online (flash-style) running max/sum carried across j
    # plus a cheap normalization pass, removing the tile_b*V VMEM residency.
    @pl.when(j == pl.num_programs(1) - 1)
    def _softmax():
        logits = logits_ref[...]
        m = jnp.max(logits, axis=1, keepdims=True)
        e = jnp.exp(logits - m)
        s = jnp.sum(e, axis=1, keepdims=True)
        probs_ref[...] = e / s                     # exact divide: torch parity


def _largest_tile(full, desired, quantum):
    """Largest multiple of `quantum` that divides `full` and is <= desired.
    Falls back to `full` (a full-extent block always satisfies Mosaic's
    'divisible by (8, 128) or equal to the full dim' rule)."""
    desired = min(desired, full)
    best = None
    t = quantum
    while t <= desired:
        if full % t == 0:
            best = t
        t += quantum
    return best if best is not None else full


def _vmem_limit_bytes():
    """Per-generation scoped-VMEM limit: physical minus headroom, capped."""
    try:
        phys = pltpu.get_tpu_info().vmem_capacity_bytes
    except Exception:
        phys = 64 * 1024 * 1024            # conservative (v7x-sized) fallback
    return int(min(phys - 8 * 1024 * 1024, 100 * 1024 * 1024))


def word2vec_forward(x, emb, w_out, b_out, *, tile_v=None, tile_b=None):
    """Forward pass of the CBOW WORD2VEC module.

    x:     (B, W) int32 context-window token ids (0 == 'NULL' padding)
    emb:   (V, N) f32 embedding table (row 0 zero, padding_idx=0)
    w_out: (V, N) f32 h2o Linear weight (PyTorch layout)
    b_out: (V,)   f32 h2o Linear bias
    Returns (logits, probs), each (B, V) f32.
    """
    B, W = x.shape
    V, N = emb.shape
    assert w_out.shape == (V, N) and b_out.shape == (V,)

    # ---- Embedding lookup + window mean (vectorized XLA gather). -----------
    # Row 0 of `emb` is the padding row (padding_idx=0, all zeros); the mean
    # divides by W *including* padding positions, exactly matching
    # `embed.data.mean(dim=1)` in the PyTorch module.
    x = x.astype(jnp.int32)
    h = jnp.mean(emb.astype(jnp.float32)[x], axis=1)          # (B, N) f32
    h_bf = h.astype(jnp.bfloat16)          # cast hoisted out of the kernel

    # ---- One-time parameter prep in HBM. ------------------------------------
    # bf16 weight stream halves HBM traffic (the kernel is weight-stream bound
    # at real word2vec shapes); f32 accumulation on the MXU.  In a training
    # loop this transpose/cast lives with the parameters, not per call.
    w_t = w_out.astype(jnp.float32).T.astype(jnp.bfloat16)    # (N, V) bf16
    b2 = b_out.reshape(1, V).astype(jnp.float32)

    vmem_limit = _vmem_limit_bytes()

    # ---- Tile selection. -----------------------------------------------------
    if tile_v is None:
        tile_v = 512                # multiple of 256 (v6e/v7x MXU), 128 (v5e)
    tile_v = _largest_tile(V, tile_v, 128)

    if tile_b is None:
        # Large batch tiles amortize the streamed weight (arithmetic intensity
        # ~ tile_b FLOP per weight byte); keep >= 2 batch tiles so the
        # "parallel" axis can shard across v7x's two TensorCores; bound by the
        # resident (logits + probs) output slabs (double-buffered, f32).
        slab_budget = vmem_limit // 2
        cap_from_vmem = max(16, slab_budget // (2 * 2 * V * 4))
        desired = min(B, 512, cap_from_vmem)
        if B >= 32:
            desired = min(desired, B // 2)      # >= 2 batch tiles when possible
        tile_b = _largest_tile(B, desired, 16)

    num_b = B // tile_b
    num_v = V // tile_v

    grid_spec = pltpu.PrefetchScalarGridSpec(
        num_scalar_prefetch=0,
        grid=(num_b, num_v),
        in_specs=[
            pl.BlockSpec((tile_b, N), lambda i, j: (i, 0)),    # h (batch tile)
            pl.BlockSpec((N, tile_v), lambda i, j: (0, j)),    # W_out^T tile
            pl.BlockSpec((1, tile_v), lambda i, j: (0, j)),    # bias tile
        ],
        out_specs=(
            pl.BlockSpec((tile_b, V), lambda i, j: (i, 0)),    # logits (resident)
            pl.BlockSpec((tile_b, V), lambda i, j: (i, 0)),    # probs
        ),
    )

    out_shapes = (
        jax.ShapeDtypeStruct((B, V), jnp.float32),
        jax.ShapeDtypeStruct((B, V), jnp.float32),
    )

    return pl.pallas_call(
        _word2vec_kernel,
        grid_spec=grid_spec,
        out_shape=out_shapes,
        compiler_params=pltpu.CompilerParams(
            dimension_semantics=("parallel", "arbitrary"),
            vmem_limit_bytes=vmem_limit,
        ),
    )(h_bf, w_t, b2)


if __name__ == "__main__":
    # Small shapes consistent with the module: N (word-vector size) = 32,
    # half_window_size = 2 -> W = 4 context tokens, V (vocab) = 1024,
    # B (batch of context windows) = 32.
    B, W, N, V = 32, 4, 32, 1024

    key = jax.random.PRNGKey(0)
    k_emb, k_w, k_b, k_x = jax.random.split(key, 4)

    # nn.Embedding(V, N, padding_idx=0): N(0,1) init with row 0 zeroed.
    emb = jax.random.normal(k_emb, (V, N), dtype=jnp.float32)
    emb = emb.at[0].set(0.0)

    # nn.Linear(N, V): weight (V, N), bias (V,), U(-1/sqrt(N), 1/sqrt(N)).
    bound = 1.0 / jnp.sqrt(jnp.float32(N))
    w_out = jax.random.uniform(k_w, (V, N), jnp.float32, -bound, bound)
    b_out = jax.random.uniform(k_b, (V,), jnp.float32, -bound, bound)

    # Context-window token ids (id 0 == 'NULL' padding appears occasionally).
    x = jax.random.randint(k_x, (B, W), 0, V, dtype=jnp.int32)

    logits, probs = word2vec_forward(x, emb, w_out, b_out)
    jax.block_until_ready((logits, probs))

    # Pure-JAX reference with the same bf16-weight / f32-accumulation recipe.
    h_ref = jnp.mean(emb[x], axis=1)                                   # (B, N)
    logits_ref = jnp.dot(h_ref.astype(jnp.bfloat16),
                         w_out.T.astype(jnp.bfloat16),
                         preferred_element_type=jnp.float32) + b_out
    probs_ref = jax.nn.softmax(logits_ref, axis=1)

    assert logits.shape == (B, V) and probs.shape == (B, V)
    assert jnp.allclose(logits, logits_ref, atol=2e-3, rtol=2e-3), \
        float(jnp.max(jnp.abs(logits - logits_ref)))
    assert jnp.allclose(probs, probs_ref, atol=1e-3, rtol=1e-2), \
        float(jnp.max(jnp.abs(probs - probs_ref)))
    assert jnp.allclose(jnp.sum(probs, axis=1), 1.0, atol=1e-3)

    print("KERNEL_OK")
</pallas_src>

<mosaic_0001>
module attributes {stable_mosaic.version = 11 : i64} {
  func.func @_word2vec_kernel(%arg0: i32, %arg1: i32, %arg2: memref<16x32xbf16, #tpu.memory_space<vmem>>, %arg3: memref<32x512xbf16, #tpu.memory_space<vmem>>, %arg4: memref<1x512xf32, #tpu.memory_space<vmem>>, %arg5: memref<16x1024xf32, #tpu.memory_space<vmem>>, %arg6: memref<16x1024xf32, #tpu.memory_space<vmem>>) attributes {dimension_semantics = [#tpu.dimension_semantics<parallel>, #tpu.dimension_semantics<arbitrary>], iteration_bounds = array<i64: 2, 2>, scalar_prefetch = 0 : i64, scratch_operands = 0 : i64, tpu.core_type = #tpu.core_type<tc>, window_params = [{transform_indices = @transform_0, window_bounds = array<i64: 16, 32>}, {transform_indices = @transform_1, window_bounds = array<i64: 32, 512>}, {transform_indices = @transform_2, window_bounds = array<i64: 1, 512>}, {transform_indices = @transform_3, window_bounds = array<i64: 16, 1024>}, {transform_indices = @transform_4, window_bounds = array<i64: 16, 1024>}]} {
    %c0 = arith.constant 0 : index
    %c0_0 = arith.constant 0 : index
    %0 = vector.load %arg2[%c0, %c0_0] : memref<16x32xbf16, #tpu.memory_space<vmem>>, vector<16x32xbf16>
    %c0_1 = arith.constant 0 : index
    %c0_2 = arith.constant 0 : index
    %1 = vector.load %arg3[%c0_1, %c0_2] : memref<32x512xbf16, #tpu.memory_space<vmem>>, vector<32x512xbf16>
    %cst = arith.constant dense<0.000000e+00> : vector<16x512xf32>
    %2 = tpu.matmul %0, %1, %cst {dimension_numbers = #tpu.dot_dimension_numbers<[1], [0], [0], [1], [0, 0, 1, 1], [], []>} : vector<16x32xbf16>, vector<32x512xbf16>, vector<16x512xf32> -> vector<16x512xf32>
    %c0_3 = arith.constant 0 : index
    %c0_4 = arith.constant 0 : index
    %3 = vector.load %arg4[%c0_3, %c0_4] : memref<1x512xf32, #tpu.memory_space<vmem>>, vector<1x512xf32>
    %4 = vector.broadcast %3 : vector<1x512xf32> to vector<16x512xf32>
    %5 = arith.addf %2, %4 : vector<16x512xf32>
    %c512_i32 = arith.constant 512 : i32
    %6 = arith.muli %arg1, %c512_i32 : i32
    %7 = tpu.assume_multiple %6, 128 : i32
    %c0_5 = arith.constant 0 : index
    %8 = arith.index_cast %7 : i32 to index
    %9 = vector.load %arg5[%c0_5, %8] : memref<16x1024xf32, #tpu.memory_space<vmem>>, vector<16x512xf32>
    tpu.vector_store %arg5[%c0_5, %8], %5 {strides = array<i32>} : memref<16x1024xf32, #tpu.memory_space<vmem>>, vector<16x512xf32>,
    %c1_i32 = arith.constant 1 : i32
    %10 = arith.cmpi eq, %arg1, %c1_i32 : i32
    %11 = arith.extui %10 : i1 to i32
    %c0_i32 = arith.constant 0 : i32
    %12 = arith.cmpi ne, %11, %c0_i32 : i32
    scf.if %12 {
      %c0_6 = arith.constant 0 : index
      %c0_7 = arith.constant 0 : index
      %13 = vector.load %arg5[%c0_6, %c0_7] : memref<16x1024xf32, #tpu.memory_space<vmem>>, vector<16x1024xf32>
      %cst_8 = arith.constant dense<0xFF800000> : vector<16xf32>
      %14 = vector.multi_reduction <maximumf>, %13, %cst_8 [1] : vector<16x1024xf32> to vector<16xf32>
      %15 = vector.shape_cast %14 : vector<16xf32> to vector<16x1xf32>
      %16 = vector.broadcast %15 : vector<16x1xf32> to vector<16x1024xf32>
      %17 = arith.subf %13, %16 : vector<16x1024xf32>
      %18 = math.exp %17 : vector<16x1024xf32>
      %cst_9 = arith.constant dense<0.000000e+00> : vector<16xf32>
      %19 = vector.multi_reduction <add>, %18, %cst_9 [1] : vector<16x1024xf32> to vector<16xf32>
      %20 = vector.shape_cast %19 : vector<16xf32> to vector<16x1xf32>
      %21 = vector.broadcast %20 : vector<16x1xf32> to vector<16x1024xf32>
      %22 = arith.divf %18, %21 : vector<16x1024xf32>
      %c0_10 = arith.constant 0 : index
      %c0_11 = arith.constant 0 : index
      %23 = vector.load %arg6[%c0_10, %c0_11] : memref<16x1024xf32, #tpu.memory_space<vmem>>, vector<16x1024xf32>
      tpu.vector_store %arg6[%c0_10, %c0_11], %22 {strides = array<i32>} : memref<16x1024xf32, #tpu.memory_space<vmem>>, vector<16x1024xf32>,
    } else {
    }
    return
  }
  func.func @transform_0(%arg0: i32, %arg1: i32) -> (i32, i32) {
    %c0_i32 = arith.constant 0 : i32
    %c0_i32_0 = arith.constant 0 : i32
    return %arg0, %c0_i32 : i32, i32
  }
  func.func @transform_1(%arg0: i32, %arg1: i32) -> (i32, i32) {
    %c0_i32 = arith.constant 0 : i32
    %c0_i32_0 = arith.constant 0 : i32
    return %c0_i32, %arg1 : i32, i32
  }
  func.func @transform_2(%arg0: i32, %arg1: i32) -> (i32, i32) {
    %c0_i32 = arith.constant 0 : i32
    %c0_i32_0 = arith.constant 0 : i32
    return %c0_i32, %arg1 : i32, i32
  }
  func.func @transform_3(%arg0: i32, %arg1: i32) -> (i32, i32) {
    %c0_i32 = arith.constant 0 : i32
    %c0_i32_0 = arith.constant 0 : i32
    return %arg0, %c0_i32 : i32, i32
  }
  func.func @transform_4(%arg0: i32, %arg1: i32) -> (i32, i32) {
    %c0_i32 = arith.constant 0 : i32
    %c0_i32_0 = arith.constant 0 : i32
    return %arg0, %c0_i32 : i32, i32
  }
}

</mosaic_0001>

<bundles_post_ra>
// kernel: tpu_custom_call.1
= control target key start
LH: loop header
LB: loop body
LE: loop exit
PB: predicated region body
PF: predicated region fallthrough
CT: control target
= control target key end

     0   :  { %s1790_s0 = inlined_call_operand.hbm [shape: bf16[32,32], index: 0, kind: input, shape index: {}]   ;;  %s1791_s1 = inlined_call_operand.hbm [shape: bf16[32,1024], index: 1, kind: input, shape index: {}]   ;;  %s1792_s2 = inlined_call_operand.hbm [shape: f32[1,1024], index: 2, kind: input, shape index: {}]   ;;  %s1793_s3 = inlined_call_operand.hbm [shape: f32[32,1024], index: 3, kind: output, shape index: {0}]   ;;  %s1794_s4 = inlined_call_operand.hbm [shape: f32[32,1024], index: 4, kind: output, shape index: {1}]  }
   0x1   :  { %1808 = sst [smem:[#allocation21_spill]] %s1790_s0 }
   0x2   :  { %1809 = sst [smem:[#allocation22_spill]] %s1791_s1 }
   0x3   :  { %1810 = sst [smem:[#allocation23_spill]] %s1793_s3 }
   0x4   :  { %1811 = sst [smem:[#allocation24_spill]] %s1794_s4 }
   0x5   :  { %10 = vsyncpa [#allocation3], 0 }
   0x6   :  { %12 = vsyncpa [#allocation3 + $0x1], 0 }
   0x7   :  { %13 = vsyncpa [#allocation6], 0 }
   0x8   :  { %15 = vsyncpa [#allocation6 + $0x1], 0 }
   0x9   :  { %16 = vsyncpa [#allocation4], 0 }
   0xa   :  { %18 = vsyncpa [#allocation4 + $0x1], 0 }
   0xb   :  { %19 = vsyncpa [#allocation10], 0 }
   0xc   :  { %21 = vsyncpa [#allocation10 + $0x1], 0  ;;  %s1348_s15 = smov 0   ;;  %s1350_s16 = smov 0  }
   0xd   :  { %s1352_s17 = smov 0   ;;  %s1354_s18 = smov 0  }
   0xe   :  { %s1356_s19 = smov 0   ;;  %s1358_s20 = smov 0  }
   0xf   :  { %s1360_s21 = smov 0   ;;  %s1362_s22 = smov 0  }
  0x10   :  { %s1364_s23 = smov 0   ;;  %s1366_s24 = smov 0  }
  0x11   :  { %s1368_s25 = smov 0  }
  0x12 LB: > { %1812 = sst [smem:[#allocation15_spill]] %s1288_s20  ;;  %s36_s26 = sadd.s32 1, %s1300_s23  ;;  %s1308_s25 = sphi %s1368_s25, %s27_s25   ;;  %s1304_s24 = sphi %s1366_s24, %s1848_s24   ;;  %s1300_s23 = sphi %s1364_s23, %s1855_s23   ;;  %s1296_s22 = sphi %s1362_s22, %s1846_s22   ;;  %s1292_s21 = sphi %s1360_s21, %s1854_s21   ;;  %s1288_s20 = sphi %s1358_s20, %s1845_s20   ;;  %s1284_s19 = sphi %s1356_s19, %s1853_s19   ;;  %s1280_s18 = sphi %s1354_s18, %s1852_s18   ;;  %s1276_s17 = sphi %s1352_s17, %s1851_s17   ;;  %s1272_s16 = sphi %s1350_s16, %s1850_s16   ;;  %s1268_s15 = sphi %s1348_s15, %s1849_s15  }
  0x13   : > { %1813 = sst [smem:[#allocation16_spill]] %s1304_s24  ;;  %p1796_p0 = scmp.eq.s32.totalorder %s1308_s25, 0 }
  0x14   : > { %p1405_p1 = scmp.ge.s32.totalorder %s36_s26, 2  ;;  %s72_s28 = sadd.s32 1, %s1276_s17 }
  0x15   : > { %p79_p2 = scmp.ne.s32.totalorder %s1276_s17, %s1272_s16  ;;  %p1795_p5 = scmp.lt.s32.totalorder %s1308_s25, 4 }
  0x16   : > { %s1857_s26 = smov (%p1405_p1, %s36_s26), 0  ;;  %s208_s30 = sand.u32 1, %s1308_s25  }
  0x17   : > { %1815 = sst [smem:[#allocation17_spill]] %s1857_s26  ;;  %p81_p4 = por %p79_p2, %p1796_p0 }
  0x18   : > { %s69_s29 = ssub.s32 %s1300_s23, %s1857_s26  ;;  %s1797_s5 = sand.u32 1, %s1276_s17  }
  0x19   : > { %p70_p6 = scmp.eq.s32.totalorder %s69_s29, 0  ;;  %s843_s7 = sshll.u32 %s1797_s5, 6 }
  0x1a   : > { %s880_s8 = sshll.u32 %s1300_s23, 8  ;;  %s1817_s1 = sld [smem:[#allocation22_spill]] }
  0x1b   : > { %s1426_s6 = scalar_select %p70_p6, %s1276_s17, %s72_s28  }
  0x1c   : > { %s212_s12 = scalar_lea.vmem [#allocation5], %s843_s7  ;;  %p1438_p7 = pnand %p1795_p5, %p81_p4 }
  0x1d   : > { %1816 = sst [smem:[#allocation18_spill]] %s1426_s6  ;;  %s219_s13 = sshll.u32 %s212_s12, 4  ;;  %s1442_s13 = int_to_ptr.vmem [resolvable:$true] %s219_s13 }
  0x1e   : > { %s1445_s28 = scalar_lea.sflag [#allocation6], %s208_s30  ;;  %p1799_p10 = pneg %p1438_p7 }
  0x20   : > { %s1434_s11 = scalar_lea.hbm %s1817_s1, %s880_s8  ;;  %s1065_s9 = scalar_lea.hbm %s1817_s1, 2048 }
  0x21   : > { %s1060_s29 = scalar_lea.hbm %s1434_s11, 1024  ;;  %p1066_p13 = scmp.lt.u32.totalorder %s1434_s11, %s1817_s1 }
  0x22   : > { %p1061_p9 = scmp.ne.s32.totalorder %s1434_s11, %s1060_s29  ;;  %p1067_p2 = scmp.lt.u32.totalorder %s1065_s9, %s1060_s29 }
  0x23   : > { %p1069_p6 = scmp.lt.u32.totalorder %s1060_s29, %s1434_s11 }
  0x24   : > { %p1063_p11 = pnand %p1799_p10, %p1061_p9  ;;  %p1068_p4 = por %p1067_p2, %p1066_p13 }
  0x26   : > { %p1064_p12 = pneg %p1063_p11  ;;  %p1070_p5 = por %p1069_p6, %p1068_p4 }
  0x28   : > { %p1071_p3 = pnand %p1070_p5, %p1064_p12 }
  0x2a   : > { %1074 = shalt.err (!%p1071_p3)
}
  0x2b   : > { %s1075_s30 = scalar_lea.vmem %s1442_s13, 1024  ;;  %s1310_s7 = smov [#allocation5]  }
  0x2c   : > { %p1076_p9 = scmp.ne.s32.totalorder %s1442_s13, %s1075_s30  ;;  %s1080_s8 = sshll.u32 %s1310_s7, 4  ;;  %s1081_s8 = int_to_ptr.vmem [resolvable:$false] %s1080_s8 }
  0x2d   : > { %s1082_s10 = scalar_lea.vmem %s1081_s8, 2048  ;;  %p1083_p8 = scmp.lt.s32.totalorder %s1442_s13, %s1081_s8 }
  0x2e   : > { %p1078_p11 = pnand %p1076_p9, %p1799_p10  ;;  %p1084_p13 = scmp.lt.s32.totalorder %s1082_s10, %s1075_s30 }
  0x30   : > { %p1079_p0 = pneg %p1078_p11  ;;  %p1085_p2 = por %p1084_p13, %p1083_p8 }
  0x32   : > { %p1086_p4 = pnand %p1085_p2, %p1079_p0 }
  0x34   : > { %1089 = shalt.err (!%p1086_p4)
}
  0x35   : > { %s1311_s29 = smov 512   ;;  %s1312_s9 = smov 256  }
  0x36   : > { %s1313_s12 = smov 16   ;;  %p246_p0 = scmp.lt.s32.totalorder %s1308_s25, 5 }
  0x37   : > { %902 = dma.hbm_to_vmem [thread:$0]  (!%p1438_p7), %s1434_s11, 1024, %s1442_s13, %s1445_s28, %s1311_s29, %s1312_s9, %s1313_s12  }
  0x38   : > { %p1819_p3 = scmp.ge.s32.totalorder %s1308_s25, 1  ;;  %s1481_s7 = sadd.s32 4294967295, %s1308_s25  }
  0x39   : > { %s837_s8 = sadd.s32 4294967294, %s1308_s25   ;;  %s39_s10 = sadd.s32 1, %s1304_s24 }
  0x3a   : > { %p1476_p5 = pnand %p1819_p3, %p246_p0  ;;  %s46_s5 = sadd.s32 1, %s1288_s20 }
  0x3b   : > { %s1859_s10 = smov (!%p1405_p1, %s39_s10), %s1304_s24  ;;  %p53_p8 = scmp.ne.s32.totalorder %s1288_s20, %s1284_s19 }
  0x3c   : > { %s1820_s30 = scalar_select %p1476_p5, 1, 0 }
  0x3d   : > { %p59_p12 = scmp.ne.s32.totalorder %s1284_s19, %s1280_s18  ;;  %p41_p6 = scmp.ge.s32.totalorder %s1859_s10, 2 }
  0x3e   : > { %p60_p9 = scmp.eq.s32.totalorder %s1481_s7, 0  ;;  %p1821_p11 = scmp.eq.s32.totalorder %s1308_s25, 0 }
  0x3f   : > { %p135_p2 = scmp.eq.s32.totalorder %s1481_s7, 3  ;;  %s1861_s10 = smov (%p41_p6, %s1859_s10), 0 }
  0x40   : > { %p1496_p13 = por %p1821_p11, %p53_p8  ;;  %1823 = sst [smem:[#allocation19_spill]] %s1861_s10 }
  0x41   : > { %p1506_p1 = por %p60_p9, %p59_p12  ;;  %p1825_p4 = scmp.ne.s32.totalorder %s1272_s16, %s1268_s15 }
  0x42   : > { %s43_s29 = ssub.s32 %s1304_s24, %s1861_s10  ;;  %p1519_p3 = por %p135_p2, %p53_p8 }
  0x43   : > { %s1824_s27 = scalar_select %p1506_p1, 1, 0 }
  0x44   : > { %p1513_p0 = por %p1825_p4, %p60_p9  ;;  %p44_p11 = scmp.eq.s32.totalorder %s43_s29, 0 }
  0x45   : > { %s1827_s9 = scalar_select %p1519_p3, 1, 0 }
  0x46   : > { %s1826_s13 = scalar_select %p1513_p0, 1, 0 }
  0x47   : > { %p141_p6 = scmp.eq.s32.totalorder %s837_s8, 3  ;;  %s187_s12 = sand.u32 1, %s1288_s20  }
  0x48   : > { %s879_s1 = sshll.u32 %s1304_s24, 7  ;;  %s840_s15 = sshll.u32 %s187_s12, 3 }
  0x49   : > { %s1526_s26 = scalar_select %p44_p11, %s1288_s20, %s46_s5  }
  0x4a   : > { %p1531_p10 = por %p141_p6, %p59_p12  ;;  %s1830_s0 = sld [smem:[#allocation21_spill]] }
  0x4b   : > { %1828 = sst [smem:[#allocation20_spill]] %s1526_s26  ;;  %p1831_p8 = scmp.lt.s32.totalorder %s1308_s25, 4 }
  0x4c   : > { %s1829_s6 = scalar_select %p1531_p10, 1, 0 }
  0x4d   : > { %p1544_p9 = pnand %p1831_p8, %p1496_p13  ;;  %s191_s8 = scalar_lea.vmem [#allocation2], %s840_s15 }
  0x4e   : > { %s198_s29 = sshll.u32 %s191_s8, 4  ;;  %s1833_s24 = sand.u32 1, %s1276_s17   ;;  %s1548_s29 = int_to_ptr.vmem [resolvable:$true] %s198_s29 }
  0x4f   : > { %s1552_s3 = sshll.u32 %s1833_s24, 2  ;;  %p1092_p2 = pneg %p1544_p9 }
  0x50   : > { %s1538_s10 = scalar_lea.hbm %s1830_s0, %s879_s1  ;;  %s1554_s1 = scalar_lea.sflag [#allocation3], %s187_s12 }
  0x51   : > { %s1090_s4 = scalar_lea.hbm %s1538_s10, 128  ;;  %s1095_s15 = scalar_lea.hbm %s1830_s0, 256 }
  0x52   : > { %p1091_p12 = scmp.ne.s32.totalorder %s1538_s10, %s1090_s4  ;;  %p1096_p11 = scmp.lt.u32.totalorder %s1538_s10, %s1830_s0 }
  0x53   : > { %p1097_p6 = scmp.lt.u32.totalorder %s1095_s15, %s1090_s4  ;;  %p1099_p10 = scmp.lt.u32.totalorder %s1090_s4, %s1538_s10 }
  0x54   : > { %p1093_p13 = pnand %p1092_p2, %p1091_p12 }
  0x55   : > { %p1098_p8 = por %p1097_p6, %p1096_p11 }
  0x56   : > { %p1094_p4 = pneg %p1093_p13 }
  0x57   : > { %p1100_p3 = por %p1099_p10, %p1098_p8 }
  0x59   : > { %p1101_p0 = pnand %p1100_p3, %p1094_p4 }
  0x5b   : > { %1104 = shalt.err (!%p1101_p0)
}
  0x5c   : > { %s1105_s24 = scalar_lea.vmem %s1548_s29, 128  ;;  %s1314_s26 = smov [#allocation2]  }
  0x5d   : > { %p1106_p12 = scmp.ne.s32.totalorder %s1548_s29, %s1105_s24  ;;  %s1110_s12 = sshll.u32 %s1314_s26, 4  ;;  %s1111_s12 = int_to_ptr.vmem [resolvable:$false] %s1110_s12 }
  0x5e   : > { %s1112_s20 = scalar_lea.vmem %s1111_s12, 256  ;;  %p1113_p5 = scmp.lt.s32.totalorder %s1548_s29, %s1111_s12 }
  0x5f   : > { %p1108_p13 = pnand %p1106_p12, %p1092_p2  ;;  %p1114_p11 = scmp.lt.s32.totalorder %s1112_s20, %s1105_s24 }
  0x61   : > { %p1109_p1 = pneg %p1108_p13  ;;  %p1115_p6 = por %p1114_p11, %p1113_p5 }
  0x63   : > { %p1116_p10 = pnand %p1115_p6, %p1109_p1 }
  0x65   : > { %1119 = shalt.err (!%p1116_p10)
}
  0x66   : > { %s1315_s4 = smov 64   ;;  %s1316_s11 = smov 4  }
  0x67   : > { %899 = dma.hbm_to_vmem [thread:$0]  (!%p1544_p9), %s1538_s10, 128, %s1548_s29, %s1554_s1, %s1315_s4, %s1315_s4, %s1316_s11  }
  0x68   : > { %s881_s15 = sshll.u32 %s1300_s23, 6  ;;  %s233_s24 = scalar_lea.vmem [#allocation7], %s1552_s3 }
  0x69   : > { %s1586_s12 = scalar_lea.hbm %s1792_s2, %s881_s15  ;;  %s241_s20 = sshll.u32 %s233_s24, 4  ;;  %s242_s20 = int_to_ptr.vmem [resolvable:$true] %s241_s20 }
  0x6a   : > { %s1120_s0 = scalar_lea.hbm %s1586_s12, 64  ;;  %p1834_p1 = pneg %p1438_p7 }
  0x6b   : > { %p1121_p5 = scmp.ne.s32.totalorder %s1586_s12, %s1120_s0  ;;  %s1125_s29 = scalar_lea.hbm %s1792_s2, 128 }
  0x6c   : > { %p1126_p9 = scmp.lt.u32.totalorder %s1586_s12, %s1792_s2  ;;  %p1127_p2 = scmp.lt.u32.totalorder %s1125_s29, %s1120_s0 }
  0x6d   : > { %p1123_p0 = pnand %p1121_p5, %p1834_p1  ;;  %p1129_p8 = scmp.lt.u32.totalorder %s1120_s0, %s1586_s12 }
  0x6e   : > { %p1128_p4 = por %p1127_p2, %p1126_p9 }
  0x6f   : > { %p1124_p3 = pneg %p1123_p0 }
  0x70   : > { %p1130_p12 = por %p1129_p8, %p1128_p4 }
  0x72   : > { %p1131_p13 = pnand %p1130_p12, %p1124_p3 }
  0x74   : > { %1134 = shalt.err (!%p1131_p13)
}
  0x75   : > { %s1135_s3 = scalar_lea.vmem %s242_s20, 64  ;;  %p1835_p6 = pmov %p1834_p1 }
  0x76   : > { %p1136_p11 = scmp.ne.s32.totalorder %s242_s20, %s1135_s3  ;;  %s1317_s11 = smov [#allocation7]  }
  0x77   : > { %s1140_s15 = sshll.u32 %s1317_s11, 4  ;;  %s1141_s15 = int_to_ptr.vmem [resolvable:$false] %s1140_s15 }
  0x78   : > { %p1138_p10 = pnand %p1136_p11, %p1835_p6  ;;  %s1142_s8 = scalar_lea.vmem %s1141_s15, 128 }
  0x79   : > { %p1143_p1 = scmp.lt.s32.totalorder %s242_s20, %s1141_s15  ;;  %p1144_p0 = scmp.lt.s32.totalorder %s1142_s8, %s1135_s3 }
  0x7a   : > { %p1139_p5 = pneg %p1138_p10 }
  0x7b   : > { %p1145_p2 = por %p1144_p0, %p1143_p1 }
  0x7d   : > { %p1146_p9 = pnand %p1145_p2, %p1139_p5 }
  0x7f   : > { %1149 = shalt.err (!%p1146_p9)
}
  0x80   : > { %905 = dma.hbm_to_vmem [thread:$0]  (!%p1438_p7), %s1586_s12, 64, %s242_s20, %s1445_s28  }
  0x81   : > { %p1836_p3 = scmp.ne.s32.totalorder %s1820_s30, 0 }
  0x82   : > { %s1612_s0 = sand.u32 (!%p1836_p3), 1, %s1284_s19   ;;  %p1837_p4 = scmp.ne.s32.totalorder (!%p1836_p3), %s1824_s27, 0 }
  0x83   : > { %250 = sbr.rel (%p1836_p3) target bundleno = 775 (0x307), region = 32  ;;  %s850_s26 = sshll.u32 (!%p1836_p3), %s1612_s0, 3 }
  0x84   : > { %s253_s24 = scalar_lea.sflag (!%p1836_p3), [#allocation3], %s1612_s0  ;;  %s256_s10 = scalar_lea.vmem (!%p1836_p3), [#allocation2], %s850_s26 }
  0x8a   : > { %1251 = dma.done.wait (%p1837_p4), %s253_s24, 128  }
  0x8b   : > { %1253 = vsyncadd (%p1837_p4), %s253_s24, 4294967168  ;;  %s261_s14 = sand.u32 1, %s1481_s7   ;;  %s263_s28 = sand.u32 1, %s1272_s16  }
  0x8c   : > { %s851_s30 = sshll.u32 %s263_s28, 6  ;;  %s262_s12 = scalar_lea.sflag [#allocation6], %s261_s14 }
  0x8d   : > { %s265_s20 = scalar_lea.vmem [#allocation5], %s851_s30  ;;  %p1838_p7 = scmp.ne.s32.totalorder %s1826_s13, 0 }
  0x8f   : > { %1255 = dma.done.wait (%p1838_p7), %s262_s12, 1088  }
  0x90   : > { %1257 = vsyncadd (%p1838_p7), %s262_s12, 4294966208  ;;  %v1318_v0 = vmov 0   ;;  %s853_s27 = sshll.u32 %s1612_s0, 7  ;;  %v1011_v1 = vld [vmem:[%s265_s20 + $0x4] ss:$16 sps:$4 sm:$0xff]   ;;  %vm397_vm0 = vcmask 261120   ;;  %v332_v10 = vlaneseq }
  0x91   : > { %433 = vmatprep.mubr.bf16.mxu0 %v1318_v0  ;;  %476 = vmatprep.mubr.bf16.mxu1 %v1318_v0  ;;  %v1013_v2 = vld [vmem:[%s265_s20 + $0xc] ss:$16 sps:$4 sm:$0xff]   ;;  %v1015_v3 = vld [vmem:[%s265_s20] ss:$16 sps:$4 sm:$0xff]   ;;  %v1016_v4 = vld [vmem:[%s265_s20 + $0x8] ss:$16 sps:$4 sm:$0xff]  }
  0x92   : > { %401 = vmatprep.subr.bf16.mxu0 %v1011_v1  ;;  %444 = vmatprep.subr.bf16.mxu1 %v1013_v2  ;;  %v1017_v5 = vld [vmem:[%s265_s20 + $0x24] ss:$16 sps:$4 sm:$0xff]   ;;  %v1019_v6 = vld [vmem:[%s265_s20 + $0x2c] ss:$16 sps:$4 sm:$0xff]   ;;  %v1021_v7 = vld [vmem:[%s265_s20 + $0x20] ss:$16 sps:$4 sm:$0xff]  }
  0x93   : > { %402 = vmatpush1.bf16.msra.mxu0 %v1015_v3  ;;  %445 = vmatpush1.bf16.msra.mxu1 %v1016_v4  ;;  %v1022_v8 = vld [vmem:[%s265_s20 + $0x28] ss:$16 sps:$4 sm:$0xff]   ;;  %s852_s7 = sshll.u32 %s263_s28, 2  ;;  %v333_v11 = vshrl.u32 %v332_v10, 7  ;;  %s866_s13 = sshll.u32 %s1292_s21, 9 }
  0x94   : > { %403 = vmatprep.subr.bf16.mxu0 %v1017_v5  ;;  %446 = vmatprep.subr.bf16.mxu1 %v1019_v6  ;;  %v1023_v9 = vld [vmem:[%s256_s10] sm:$0xff]   ;;  %s274_s5 = scalar_lea.vmem [#allocation7], %s852_s7  ;;  %s488_s29 = sshra.s32 %s866_s13, 7 }
  0x95   : > { %v334_v12 = vsub.s32 0, %v333_v11  ;;  %v342_v13 = vsub.s32 2, %v333_v11  ;;  %v330_v14 = vld [vmem:[%s274_s5] sm:$0xf]  ;;  %v338_v15 = vsub.s32 1, %v333_v11  ;;  %v346_v16 = vsub.s32 3, %v333_v11 }
  0x96   : > { %s867_s1 = sshll.u32 %s488_s29, 3  ;;  %s1634_s4 = scalar_lea.vmem [#allocation8], %s853_s27 }
  0x97   : > { %404 = vmatpush1.bf16.msra.mxu0 %v1021_v7  ;;  %447 = vmatpush1.bf16.msra.mxu1 %v1022_v8  ;;  %v335_v17 = vrot.slane %v330_v14, %v334_v12  ;;  %v343_v18 = vrot.slane %v330_v14, %v342_v13  ;;  %v339_v19 = vrot.slane %v330_v14, %v338_v15  ;;  %s491_s3 = scalar_lea.vmem %s1634_s4, %s867_s1 [#allocation8]  ;;  %s1639_s11 = scalar_lea.vmem [#allocation9], %s853_s27 }
  0x98   : > { %v347_v20 = vrot.slane %v330_v14, %v346_v16  ;;  %p868_p8 = scmp.ne.s32.totalorder %s1292_s21, 1 }
  0x9a   : > { %864 = vmatmul.mubr.msk.bf16.vlgmr.msra.gmra.mrb[0].mxu0 %vm397_vm0, %v1023_v9  ;;  %865 = vmatmul.mubr.msk.bf16.vlgmr.msra.gmra.mrb[0].mxu1 %vm397_vm0, %v1023_v9 }
 0x16d   : > { %v435_v21 = vpop.f32.mrb[0].mxu0  ;;  %v478_v22 = vpop.f32.mrb[0].mxu1  ;;  %503 = sbr.rel (%p868_p8) target bundleno = 724 (0x2d4), region = 48 }
 0x16e   : > { %v436_v23 = vadd.f32 %v435_v21, %v335_v17  ;;  %v479_v24 = vadd.f32 %v478_v22, %v343_v18  ;;  %v437_v25 = vpop.f32.mrb[1].mxu0  ;;  %v480_v26 = vpop.f32.mrb[1].mxu1 }
 0x16f   : > { %v438_v27 = vadd.f32 %v437_v25, %v339_v19  ;;  %v481_v28 = vadd.f32 %v480_v26, %v347_v20  ;;  %v439_v29 = vpop.f32.mrb[2].mxu0  ;;  %v482_v30 = vpop.f32.mrb[2].mxu1 }
 0x170   : > { %492 = vst [vmem:[%s491_s3] sm:$0xff] %v436_v23  ;;  %494 = vst [vmem:[%s491_s3 + $0x10] sm:$0xff] %v479_v24  ;;  %v440_v31 = vadd.f32 %v439_v29, %v335_v17  ;;  %v483_v32 = vadd.f32 %v482_v30, %v343_v18  ;;  %v441_v33 = vpop.f32.mrb[3].mxu0  ;;  %v484_v34 = vpop.f32.mrb[3].mxu1 }
 0x171   : > { %493 = vst [vmem:[%s491_s3 + $0x8] sm:$0xff] %v438_v27  ;;  %495 = vst [vmem:[%s491_s3 + $0x18] sm:$0xff] %v481_v28  ;;  %v442_v35 = vadd.f32 %v441_v33, %v339_v19  ;;  %v485_v36 = vadd.f32 %v484_v34, %v347_v20 }
 0x172   : > { %496 = vst [vmem:[%s491_s3 + $0x40] sm:$0xff] %v440_v31  ;;  %498 = vst [vmem:[%s491_s3 + $0x50] sm:$0xff] %v483_v32 }
 0x173   : > { %497 = vst [vmem:[%s491_s3 + $0x48] sm:$0xff] %v442_v35  ;;  %499 = vst [vmem:[%s491_s3 + $0x58] sm:$0xff] %v485_v36 }
 0x17a   : > { %v504_v37 = vld [vmem:[%s1634_s4] sm:$0xff]  ;;  %v505_v38 = vld [vmem:[%s1634_s4 + $0x8] sm:$0xff]  ;;  %v506_v39 = vld [vmem:[%s1634_s4 + $0x10] sm:$0xff] }
 0x17b   : > { %v507_v40 = vld [vmem:[%s1634_s4 + $0x18] sm:$0xff]  ;;  %v508_v41 = vld [vmem:[%s1634_s4 + $0x20] sm:$0xff]  ;;  %v509_v42 = vld [vmem:[%s1634_s4 + $0x28] sm:$0xff]  ;;  %v520_v43 = vmax.f32 %v504_v37, %v506_v39 }
 0x17c   : > { %v510_v44 = vld [vmem:[%s1634_s4 + $0x30] sm:$0xff]  ;;  %v1650_v45 = vld [vmem:[%s1634_s4 + $0x38] sm:$0xff]  ;;  %v521_v46 = vmax.f32 %v505_v38, %v507_v40  ;;  %v512_v47 = vld [vmem:[%s1634_s4 + $0x40] sm:$0xff] }
 0x17d   : > { %v522_v48 = vmax.f32 %v520_v43, %v508_v41  ;;  %v513_v49 = vld [vmem:[%s1634_s4 + $0x48] sm:$0xff]  ;;  %v514_v50 = vld [vmem:[%s1634_s4 + $0x50] sm:$0xff]  ;;  %v515_v51 = vld [vmem:[%s1634_s4 + $0x58] sm:$0xff] }
 0x17e   : > { %v523_v52 = vmax.f32 %v521_v46, %v509_v42  ;;  %v516_v53 = vld [vmem:[%s1634_s4 + $0x60] sm:$0xff]  ;;  %v517_v54 = vld [vmem:[%s1634_s4 + $0x68] sm:$0xff]  ;;  %v529_v55 = vmax.f32 %v512_v47, %v514_v50  ;;  %v530_v56 = vmax.f32 %v513_v49, %v515_v51  ;;  %v518_v58 = vld [vmem:[%s1634_s4 + $0x70] sm:$0xff] }
 0x17f   : > { %v524_v57 = vmax.f32 %v522_v48, %v510_v44  ;;  %v519_v59 = vld [vmem:[%s1634_s4 + $0x78] sm:$0xff] }
 0x180   : > { %v525_v60 = vmax.f32 %v523_v52, %v1650_v45  ;;  %v531_v61 = vmax.f32 %v529_v55, %v516_v53  ;;  %v532_v62 = vmax.f32 %v530_v56, %v517_v54 }
 0x182   : > { %v526_v63 = vmax.f32 %v524_v57, %v525_v60  ;;  %v533_v0 = vmax.f32 %v531_v61, %v518_v58  ;;  %v534_v1 = vmax.f32 %v532_v62, %v519_v59 }
 0x184   : > { %527 = vmax.xlane.f32.xlu0 %v526_v63  ;;  %v535_v2 = vmax.f32 %v533_v0, %v534_v1 }
 0x188   : > { %536 = vmax.xlane.f32.xlu0 %v535_v2 }
 0x211   : > { %v528_v3 = vpop.xlane.xlu0 %527 }
 0x212   : > { %v538_v4 = vsub.f32 %v504_v37, %v528_v3  ;;  %v539_v5 = vsub.f32 %v505_v38, %v528_v3  ;;  %v540_v6 = vsub.f32 %v506_v39, %v528_v3  ;;  %v541_v7 = vsub.f32 %v507_v40, %v528_v3 }
 0x213   : > { %v542_v17 = vsub.f32 %v508_v41, %v528_v3  ;;  %v543_v22 = vsub.f32 %v509_v42, %v528_v3  ;;  %v544_v24 = vsub.f32 %v510_v44, %v528_v3  ;;  %v545_v28 = vsub.f32 %v1650_v45, %v528_v3 }
 0x214   : > { %v554_v8 = vmul.f32 1.442695, %v538_v4  ;;  %v556_v9 = vmul.f32 1.442695, %v539_v5  ;;  %v558_v10 = vmul.f32 1.442695, %v540_v6 }
 0x215   : > { %v537_v11 = vpop.xlane.xlu0 %536  ;;  %v560_v12 = vmul.f32 1.442695, %v541_v7  ;;  %v562_v26 = vmul.f32 1.442695, %v542_v17  ;;  %v564_v29 = vmul.f32 1.442695, %v543_v22 }
 0x216   : > { %1024 = vpow2.f32 %v554_v8  ;;  %v546_v13 = vsub.f32 %v512_v47, %v537_v11  ;;  %v547_v14 = vsub.f32 %v513_v49, %v537_v11  ;;  %v548_v15 = vsub.f32 %v514_v50, %v537_v11 }
 0x217   : > { %1026 = vpow2.f32 %v556_v9  ;;  %v549_v16 = vsub.f32 %v515_v51, %v537_v11  ;;  %v550_v18 = vsub.f32 %v516_v53, %v537_v11  ;;  %v551_v25 = vsub.f32 %v517_v54, %v537_v11 }
 0x218   : > { %1028 = vpow2.f32 %v558_v10  ;;  %v570_v19 = vmul.f32 1.442695, %v546_v13  ;;  %v572_v20 = vmul.f32 1.442695, %v547_v14  ;;  %v574_v21 = vmul.f32 1.442695, %v548_v15 }
 0x219   : > { %1030 = vpow2.f32 %v560_v12  ;;  %v576_v23 = vmul.f32 1.442695, %v549_v16  ;;  %v578_v27 = vmul.f32 1.442695, %v550_v18  ;;  %v552_v30 = vsub.f32 %v518_v58, %v537_v11 }
 0x21a   : > { %1032 = vpow2.f32 %v570_v19  ;;  %v566_v31 = vmul.f32 1.442695, %v544_v24  ;;  %v580_v32 = vmul.f32 1.442695, %v551_v25  ;;  %v553_v33 = vsub.f32 %v519_v59, %v537_v11 }
 0x21b   : > { %1034 = vpow2.f32 %v572_v20  ;;  %v568_v35 = vmul.f32 1.442695, %v545_v28  ;;  %v582_v37 = vmul.f32 1.442695, %v552_v30 }
 0x21c   : > { %1036 = vpow2.f32 %v574_v21  ;;  %v584_v41 = vmul.f32 1.442695, %v553_v33 }
 0x21d   : > { %1038 = vpow2.f32 %v576_v23 }
 0x21e   : > { %1040 = vpow2.f32 %v562_v26 }
 0x21f   : > { %1042 = vpow2.f32 %v578_v27 }
 0x220   : > { %v1025_v34 = vpop.eup %1024  ;;  %1044 = vpow2.f32 %v564_v29 }
 0x221   : > { %v1027_v36 = vpop.eup %1026  ;;  %1046 = vpow2.f32 %v566_v31 }
 0x222   : > { %v1029_v38 = vpop.eup %1028  ;;  %v586_v39 = vadd.f32 %v1027_v36, %v1025_v34  ;;  %1048 = vpow2.f32 %v580_v32 }
 0x223   : > { %v1031_v40 = vpop.eup %1030  ;;  %1050 = vpow2.f32 %v568_v35 }
 0x224   : > { %v1033_v42 = vpop.eup %1032  ;;  %v587_v43 = vadd.f32 %v1029_v38, %v586_v39  ;;  %1052 = vpow2.f32 %v582_v37 }
 0x225   : > { %v1035_v44 = vpop.eup %1034  ;;  %1054 = vpow2.f32 %v584_v41 }
 0x226   : > { %v588_v45 = vadd.f32 %v1031_v40, %v587_v43  ;;  %v595_v46 = vadd.f32 %v1035_v44, %v1033_v42  ;;  %v1037_v47 = vpop.eup %1036 }
 0x227   : > { %v1039_v48 = vpop.eup %1038 }
 0x228   : > { %v596_v49 = vadd.f32 %v1037_v47, %v595_v46  ;;  %v1041_v50 = vpop.eup %1040 }
 0x229   : > { %v1043_v51 = vpop.eup %1042  ;;  %v589_v52 = vadd.f32 %v1041_v50, %v588_v45 }
 0x22a   : > { %v597_v53 = vadd.f32 %v1039_v48, %v596_v49  ;;  %v1045_v54 = vpop.eup %1044 }
 0x22b   : > { %v1047_v55 = vpop.eup %1046  ;;  %v590_v56 = vadd.f32 %v1045_v54, %v589_v52 }
 0x22c   : > { %v598_v57 = vadd.f32 %v1043_v51, %v597_v53  ;;  %v1049_v58 = vpop.eup %1048 }
 0x22d   : > { %v1051_v59 = vpop.eup %1050  ;;  %v591_v60 = vadd.f32 %v1047_v55, %v590_v56 }
 0x22e   : > { %v599_v61 = vadd.f32 %v1049_v58, %v598_v57  ;;  %v1053_v62 = vpop.eup %1052 }
 0x22f   : > { %v592_v63 = vadd.f32 %v1051_v59, %v591_v60  ;;  %v1055_v1 = vpop.eup %1054 }
 0x230   : > { %v600_v0 = vadd.f32 %v1053_v62, %v599_v61 }
 0x231   : > { %593 = vadd.xlane.f32.xlu1 %v592_v63 }
 0x232   : > { %v601_v2 = vadd.f32 %v1055_v1, %v600_v0 }
 0x235   : > { %602 = vadd.xlane.f32.xlu1 %v601_v2 }
 0x2be   : > { %v594_v3 = vpop.xlane.xlu1 %593 }
 0x2bf   : > { %1056 = vrcp.f32 %v594_v3 }
 0x2c2   : > { %v603_v4 = vpop.xlane.xlu1 %602 }
 0x2c3   : > { %1058 = vrcp.f32 %v603_v4 }
 0x2c9   : > { %v1057_v5 = vpop.eup %1056 }
 0x2ca   : > { %v605_v6 = vmul.f32 %v1057_v5, %v1025_v34  ;;  %v606_v7 = vmul.f32 %v1057_v5, %v1027_v36  ;;  %v607_v8 = vmul.f32 %v1057_v5, %v1029_v38  ;;  %v608_v9 = vmul.f32 %v1057_v5, %v1031_v40 }
 0x2cb   : > { %v609_v10 = vmul.f32 %v1057_v5, %v1041_v50  ;;  %v610_v11 = vmul.f32 %v1057_v5, %v1045_v54  ;;  %v611_v12 = vmul.f32 %v1057_v5, %v1047_v55  ;;  %v612_v13 = vmul.f32 %v1057_v5, %v1051_v59 }
 0x2cc   : > { %622 = vst [vmem:[%s1639_s11] sm:$0xff] %v605_v6  ;;  %623 = vst [vmem:[%s1639_s11 + $0x8] sm:$0xff] %v606_v7 }
 0x2cd   : > { %624 = vst [vmem:[%s1639_s11 + $0x10] sm:$0xff] %v607_v8  ;;  %625 = vst [vmem:[%s1639_s11 + $0x18] sm:$0xff] %v608_v9  ;;  %v1059_v14 = vpop.eup %1058 }
 0x2ce   : > { %626 = vst [vmem:[%s1639_s11 + $0x20] sm:$0xff] %v609_v10  ;;  %627 = vst [vmem:[%s1639_s11 + $0x28] sm:$0xff] %v610_v11  ;;  %v614_v15 = vmul.f32 %v1059_v14, %v1033_v42  ;;  %v615_v16 = vmul.f32 %v1059_v14, %v1035_v44  ;;  %v616_v17 = vmul.f32 %v1059_v14, %v1037_v47 }
 0x2cf   : > { %628 = vst [vmem:[%s1639_s11 + $0x30] sm:$0xff] %v611_v12  ;;  %629 = vst [vmem:[%s1639_s11 + $0x38] sm:$0xff] %v612_v13  ;;  %v617_v18 = vmul.f32 %v1059_v14, %v1039_v48  ;;  %v618_v19 = vmul.f32 %v1059_v14, %v1043_v51  ;;  %v619_v20 = vmul.f32 %v1059_v14, %v1049_v58 }
 0x2d0   : > { %v620_v21 = vmul.f32 %v1059_v14, %v1053_v62  ;;  %v621_v22 = vmul.f32 %v1059_v14, %v1055_v1  ;;  %630 = vst [vmem:[%s1639_s11 + $0x40] sm:$0xff] %v614_v15  ;;  %631 = vst [vmem:[%s1639_s11 + $0x48] sm:$0xff] %v615_v16 }
 0x2d1   : > { %632 = vst [vmem:[%s1639_s11 + $0x50] sm:$0xff] %v616_v17  ;;  %633 = vst [vmem:[%s1639_s11 + $0x58] sm:$0xff] %v617_v18 }
 0x2d2   : > { %634 = vst [vmem:[%s1639_s11 + $0x60] sm:$0xff] %v618_v19  ;;  %635 = vst [vmem:[%s1639_s11 + $0x68] sm:$0xff] %v619_v20 }
 0x2d3   : > { %636 = vst [vmem:[%s1639_s11 + $0x70] sm:$0xff] %v620_v21  ;;  %637 = vst [vmem:[%s1639_s11 + $0x78] sm:$0xff] %v621_v22 }
 0x2d4 PF: > { %s883_s21 = sshll.u32 %s1296_s22, 11  ;;  %s1839_s26 = sld [smem:[#allocation23_spill]] }
 0x2d5   : > { %s658_s10 = sshll.u32 %s1634_s4, 4  ;;  %s639_s14 = scalar_lea.sflag [#allocation4], %s1612_s0  ;;  %s1687_s10 = int_to_ptr.vmem [resolvable:$true] %s658_s10 }
 0x2d6   : > { %s1150_s28 = scalar_lea.vmem %s1687_s10, 2048  ;;  %p1840_p13 = scmp.ne.s32.totalorder %s1827_s9, 0 }
 0x2d7   : > { %p1151_p12 = scmp.ne.s32.totalorder %s1687_s10, %s1150_s28  ;;  %s1319_s30 = smov [#allocation8]  }
 0x2d8   : > { %s1154_s12 = sshll.u32 %s1319_s30, 4  ;;  %s1155_s12 = int_to_ptr.vmem [resolvable:$false] %s1154_s12 }
 0x2d9   : > { %p1152_p11 = pnand %p1151_p12, %p1840_p13  ;;  %s1156_s20 = scalar_lea.vmem %s1155_s12, 4096 }
 0x2da   : > { %s1684_s24 = scalar_lea.hbm %s1839_s26, %s883_s21  ;;  %p1157_p10 = scmp.lt.s32.totalorder %s1687_s10, %s1155_s12 }
 0x2db   : > { %p1153_p6 = pneg %p1152_p11  ;;  %p1158_p5 = scmp.lt.s32.totalorder %s1156_s20, %s1150_s28 }
 0x2dd   : > { %p1159_p1 = por %p1158_p5, %p1157_p10 }
 0x2df   : > { %p1160_p0 = pnand %p1159_p1, %p1153_p6 }
 0x2e1   : > { %1163 = shalt.err (!%p1160_p0)
}
 0x2e2   : > { %s1164_s27 = scalar_lea.hbm %s1684_s24, 2048  ;;  %s1168_s5 = scalar_lea.hbm %s1839_s26, 4096 }
 0x2e3   : > { %p1165_p2 = scmp.ne.s32.totalorder %s1684_s24, %s1164_s27  ;;  %p1169_p4 = scmp.lt.u32.totalorder %s1684_s24, %s1839_s26 }
 0x2e4   : > { %p1170_p7 = scmp.lt.u32.totalorder %s1168_s5, %s1164_s27  ;;  %p1172_p12 = scmp.lt.u32.totalorder %s1164_s27, %s1684_s24 }
 0x2e5   : > { %p1166_p9 = pnand %p1165_p2, %p1840_p13 }
 0x2e6   : > { %p1171_p8 = por %p1170_p7, %p1169_p4 }
 0x2e7   : > { %p1167_p3 = pneg %p1166_p9 }
 0x2e8   : > { %p1173_p11 = por %p1172_p12, %p1171_p8 }
 0x2ea   : > { %p1174_p6 = pnand %p1173_p11, %p1167_p3 }
 0x2ec   : > { %1177 = shalt.err (!%p1174_p6)
}
 0x2ed   : > { %s1320_s4 = smov 1024   ;;  %s1321_s3 = smov 64  }
 0x2ee   : > { %892 = dma.vmem_to_hbm [thread:$0]  (%p1840_p13), %s1687_s10, 2048, %s1684_s24, %s639_s14, %s1320_s4, %s1320_s4, %s1321_s3  }
 0x2ef   : > { %s1841_s28 = sld [smem:[#allocation24_spill]]  ;;  %s675_s12 = sshll.u32 %s1639_s11, 4  ;;  %s1724_s12 = int_to_ptr.vmem [resolvable:$true] %s675_s12 }
 0x2f0   : > { %s644_s20 = scalar_lea.sflag [#allocation10], %s1612_s0  ;;  %s1178_s27 = scalar_lea.vmem %s1724_s12, 2048 }
 0x2f1   : > { %p1179_p10 = scmp.ne.s32.totalorder %s1724_s12, %s1178_s27  ;;  %s1322_s7 = smov [#allocation9]  }
 0x2f2   : > { %s1182_s24 = sshll.u32 %s1322_s7, 4  ;;  %s1183_s24 = int_to_ptr.vmem [resolvable:$false] %s1182_s24 }
 0x2f3   : > { %p1180_p5 = pnand %p1179_p10, %p1840_p13  ;;  %s1184_s22 = scalar_lea.vmem %s1183_s24, 4096 }
 0x2f4   : > { %p1185_p0 = scmp.lt.s32.totalorder %s1724_s12, %s1183_s24  ;;  %p1186_p2 = scmp.lt.s32.totalorder %s1184_s22, %s1178_s27 }
 0x2f5   : > { %s1721_s30 = scalar_lea.hbm %s1841_s28, %s883_s21  ;;  %p1181_p1 = pneg %p1180_p5 }
 0x2f6   : > { %p1187_p9 = por %p1186_p2, %p1185_p0 }
 0x2f8   : > { %p1188_p3 = pnand %p1187_p9, %p1181_p1 }
 0x2fa   : > { %1191 = shalt.err (!%p1188_p3)
}
 0x2fb   : > { %s1192_s11 = scalar_lea.hbm %s1721_s30, 2048  ;;  %s1196_s14 = scalar_lea.hbm %s1841_s28, 4096 }
 0x2fc   : > { %p1193_p4 = scmp.ne.s32.totalorder %s1721_s30, %s1192_s11  ;;  %p1197_p12 = scmp.lt.u32.totalorder %s1721_s30, %s1841_s28 }
 0x2fd   : > { %p1198_p11 = scmp.lt.u32.totalorder %s1196_s14, %s1192_s11  ;;  %p1200_p10 = scmp.lt.u32.totalorder %s1192_s11, %s1721_s30 }
 0x2fe   : > { %p1194_p7 = pnand %p1193_p4, %p1840_p13 }
 0x2ff   : > { %p1199_p6 = por %p1198_p11, %p1197_p12 }
 0x300   : > { %p1195_p8 = pneg %p1194_p7 }
 0x301   : > { %p1201_p5 = por %p1200_p10, %p1199_p6 }
 0x303   : > { %p1202_p1 = pnand %p1201_p5, %p1195_p8 }
 0x305   : > { %1205 = shalt.err (!%p1202_p1)
}
 0x306   : > { %893 = dma.vmem_to_hbm [thread:$0]  (%p1840_p13), %s1724_s12, 2048, %s1721_s30, %s644_s20, %s1320_s4, %s1320_s4, %s1321_s3  }
 0x307 PF: > { %p914_p0 = scmp.ge.s32.totalorder %s1308_s25, 2  ;;  %s690_s29 = sand.u32 1, %s1280_s18  }
 0x308   : > { %p1842_p2 = scmp.ne.s32.totalorder %s1829_s6, 0  ;;  %s691_s1 = scalar_lea.sflag [#allocation4], %s690_s29 }
 0x30a   : > { %p907_p9 = pnand %p914_p0, %p1842_p2 }
 0x30c   : > { %1259 = dma.done.wait (!%p907_p9), %s691_s1, 2048  }
 0x30d   : > { %1261 = vsyncadd (!%p907_p9), %s691_s1, 4294965248  ;;  %s700_s9 = scalar_lea.sflag [#allocation10], %s690_s29 }
 0x30e   : > { %1263 = dma.done.wait (!%p907_p9), %s700_s9, 2048  }
 0x30f   : > { %1265 = vsyncadd (!%p907_p9), %s700_s9, 4294965248  ;;  %s27_s25 = sadd.s32 1, %s1308_s25   ;;  %s1843_s0 = sld [smem:[#allocation18_spill]] }
 0x310   : > { %p24_p3 = scmp.ge.s32.totalorder %s27_s25, 6   ;;  %s1844_s4 = sld [smem:[#allocation15_spill]] }
 0x311   : > { %s1845_s20 = sld [smem:[#allocation20_spill]]  ;;  %s1846_s22 = sld [smem:[#allocation16_spill]] }
 0x312   : > { %s1847_s3 = sld [smem:[#allocation17_spill]]  ;;  %s1848_s24 = sld [smem:[#allocation19_spill]] }
 0x313   : > { %s1849_s15 = smov %s1272_s16  ;;  %s1850_s16 = smov %s1276_s17 }
 0x314   : > { %s1852_s18 = smov %s1284_s19  ;;  %s1854_s21 = smov %s1300_s23 }
 0x315   : > { %s1851_s17 = smov %s1843_s0  ;;  %26 = sbr.rel (!%p24_p3) target bundleno = 18 (0x12), region = 123 }
 0x316   : > { %s1853_s19 = smov %s1844_s4 }
 0x318   : > { %s1855_s23 = smov %s1847_s3 }
 0x31c   :  { %705 = vsyncpa [#allocation3], 1 }
 0x31d   :  { %707 = vsyncpa [#allocation3 + $0x1], 1 }
 0x31e   :  { %708 = vsyncpa [#allocation6], 1 }
 0x31f   :  { %710 = vsyncpa [#allocation6 + $0x1], 1 }
 0x320   :  { %711 = vsyncpa [#allocation4], 1 }
 0x321   :  { %713 = vsyncpa [#allocation4 + $0x1], 1 }
 0x322   :  { %714 = vsyncpa [#allocation10], 1 }
 0x323   :  { %716 = vsyncpa [#allocation10 + $0x1], 1 }

</bundles_post_ra>
